<compile_context>
chip_gen: v6e
topology: v6e:2x2x1
jax: 0.10.0
libtpu: 0.0.40
codegen_flags: <defaults>
</compile_context>

<pallas_src>
import functools

import jax
import jax.numpy as jnp
from jax.experimental import pallas as pl
from jax.experimental.pallas import tpu as pltpu

MAX_CHANNELS = 100
HEADS = 1     # torch_geometric FeaStConv default; softmax over a single head == 1 exactly.
LANE = 128


def _round_up(v, m):
    return (v + m - 1) // m * m


def l3_feast_kernel(ei_ref, x_ref,
                    w1_ref, b1_ref, w2_ref, b2_ref, w3_ref, b3_ref,
                    o_ref):
    """One graph per grid step: conv1 -> relu -> conv2 -> relu -> conv3 -> relu, VMEM resident."""
    n = x_ref.shape[0]
    e = ei_ref.shape[1]

    # ---- dense mean-aggregation operator from edge_index (built once, reused 3x) ----------
    ei = ei_ref[...]                                     # (2, E) int32: row0 = src j, row1 = dst i
    src = ei[0:1, :]                                     # (1, E)
    dst = ei[1:2, :]                                     # (1, E)
    row_iota = jax.lax.broadcasted_iota(jnp.int32, (n, e), 0)
    not_self = src != dst                                # drops existing AND padded self loops
    # Note: out-of-range edge indices are silently dropped by the one-hot build (unlike PyG).
    m_dst = (row_iota == dst).astype(jnp.bfloat16)                   # (N, E)
    m_src = ((row_iota == src) & not_self).astype(jnp.bfloat16)      # (N, E)
    # A[i, j] = number of non-self edges j -> i (edge multiplicities kept, like PyG 'mean').
    # bf16 operands are exact 0/1; f32 accumulation keeps integer counts exact.
    a = jax.lax.dot_general(m_dst, m_src, (((1,), (1,)), ((), ())),
                            preferred_element_type=jnp.float32)      # (N, N)
    eye = (jax.lax.broadcasted_iota(jnp.int32, (n, n), 0)
           == jax.lax.broadcasted_iota(jnp.int32, (n, n), 1)).astype(jnp.float32)
    a = a + eye                                           # one added self loop per node
    deg = jnp.sum(a, axis=1, keepdims=True)               # (N, 1), >= 1
    inv_deg = pl.reciprocal(deg, approx=True)             # EUP; normalization deferred below
    a_bf = a.astype(jnp.bfloat16)                         # exact: integer counts <= E+1 <= 256

    # ---- one FeaStConv layer (heads=1) + fused relu ---------------------------------------
    def feast_layer(xin, w_ref, b_ref):
        cin, cout = xin.shape[1], w_ref.shape[1]
        w = w_ref[...]                                     # bf16 weights
        if cin <= cout:
            # transform first: keeps the wide intermediate lane-dense, then aggregate.
            z = jnp.dot(xin.astype(jnp.bfloat16), w, preferred_element_type=jnp.float32)
            agg = inv_deg * jnp.dot(a_bf, z.astype(jnp.bfloat16),
                                    preferred_element_type=jnp.float32)
        else:
            # aggregate first when the output is narrower than the input.
            y = inv_deg * jnp.dot(a_bf, xin.astype(jnp.bfloat16),
                                  preferred_element_type=jnp.float32)
            agg = jnp.dot(y.astype(jnp.bfloat16), w, preferred_element_type=jnp.float32)
        return jnp.maximum(agg + b_ref[...], 0.0)          # + bias, fused .relu()

    x1 = feast_layer(x_ref[...], w1_ref, b1_ref)
    # dropout(p=0.1) is identity in eval mode. TODO(synk): training-mode dropout not implemented.
    x2 = feast_layer(x1, w2_ref, b2_ref)
    o_ref[...] = feast_layer(x2, w3_ref, b3_ref)


def _const_spec(shape):
    """Full-array block, same block every grid step -> DMA'd once, VMEM resident."""
    return pl.BlockSpec(shape, lambda g: (0,) * len(shape))


def _per_graph_spec(shape):
    """shape = (B, d0, d1): one graph per grid step, batch dim squeezed away in the kernel."""
    return pl.BlockSpec((None,) + tuple(shape[1:]), lambda g: (g, 0, 0))


@functools.partial(jax.jit, static_argnames=("out_channels",))
def l3_feast_forward(x, edge_index, params, *, out_channels):
    """Fused forward of the 3-layer FeaStConv stack (+ relu after each layer).

    x:          (B, N, in_channels) float32
    edge_index: (B, 2, E) int32, row 0 = source j, row 1 = destination i
    params:     list of 3 dicts with lane-padded bf16 "w" and f32 "b"
    returns     (B, N, out_channels) float32
    """
    # TODO(synk): heads > 1 (per-edge softmax attention using u, c) not implemented; the module
    # uses torch_geometric's default heads=1 for which the attention weight is exactly 1.
    b, n, _ = x.shape
    e = edge_index.shape[-1]
    e_pad = _round_up(e, LANE)
    # Pad the edge list with (0, 0) self loops: removed by the not_self mask -> result unchanged.
    edge_index = jnp.pad(edge_index, ((0, 0), (0, 0), (0, e_pad - e)))

    p1, p2, p3 = params
    cout_pad = p3["w"].shape[1]

    out = pl.pallas_call(
        l3_feast_kernel,
        out_shape=jax.ShapeDtypeStruct((b, n, cout_pad), jnp.float32),
        grid=(b,),
        in_specs=[
            _per_graph_spec(edge_index.shape),
            _per_graph_spec(x.shape),
            _const_spec(p1["w"].shape), _const_spec(p1["b"].shape),
            _const_spec(p2["w"].shape), _const_spec(p2["b"].shape),
            _const_spec(p3["w"].shape), _const_spec(p3["b"].shape),
        ],
        out_specs=_per_graph_spec((b, n, cout_pad)),
        compiler_params=pltpu.CompilerParams(
            dimension_semantics=("parallel",),       # v7x: shard graphs across both TensorCores
            vmem_limit_bytes=32 * 1024 * 1024,
        ),
    )(edge_index, x, p1["w"], p1["b"], p2["w"], p2["b"], p3["w"], p3["b"])
    return out[..., :out_channels]                   # drop the zero-padded lanes


def init_feast_params(key, cin, cout, cin_pad, cout_pad):
    """FeaStConv-style init; weights/bias zero-padded to lane-aligned shapes (exact)."""
    kw, ku, kc, kb = jax.random.split(key, 4)
    bound = 1.0 / float(cin) ** 0.5
    w = jax.random.uniform(kw, (cin, HEADS * cout), jnp.float32, -bound, bound)
    # u / c parameterize per-head attention; with heads=1 the softmax over a single head is
    # identically 1, so they do not affect the forward pass (kept for parameter fidelity only).
    u = jax.random.uniform(ku, (cin, HEADS), jnp.float32, -bound, bound)
    c = 0.1 * jax.random.normal(kc, (HEADS,), jnp.float32)
    bias = 0.1 * jax.random.normal(kb, (1, cout), jnp.float32)
    # Zero padding: padded input rows multiply zero activations, padded output columns get zero
    # weight + zero bias and stay zero through relu -> results are exact.
    w_pad = jnp.pad(w, ((0, cin_pad - cin), (0, cout_pad - cout)))
    b_pad = jnp.pad(bias, ((0, 0), (0, cout_pad - cout)))
    return {"w": w_pad.astype(jnp.bfloat16), "b": b_pad, "u": u, "c": c}


def init_l3_params(key, in_channels, out_channels):
    k1, k2, k3 = jax.random.split(key, 3)
    c1 = MAX_CHANNELS * out_channels                 # 400
    c2 = (MAX_CHANNELS // 2) * out_channels          # 200
    c1p = _round_up(c1, LANE)                        # 512
    c2p = _round_up(c2, LANE)                        # 256
    c3p = _round_up(out_channels, LANE)              # 128
    return [
        init_feast_params(k1, in_channels, c1, in_channels, c1p),
        init_feast_params(k2, c1, c2, c1p, c2p),
        init_feast_params(k3, c2, out_channels, c2p, c3p),
    ]


if __name__ == "__main__":
    key = jax.random.PRNGKey(0)
    kx, ke, kp = jax.random.split(key, 3)

    B, N, E, IN_CH, OUT_CH = 2, 32, 64, 4, 4
    x = jax.random.normal(kx, (B, N, IN_CH), jnp.float32)
    edge_index = jax.random.randint(ke, (B, 2, E), 0, N, jnp.int32)   # (src j, dst i) per graph

    params = init_l3_params(kp, IN_CH, OUT_CH)

    out = jax.block_until_ready(
        l3_feast_forward(x, edge_index, params, out_channels=OUT_CH))

    assert out.shape == (B, N, OUT_CH), out.shape
    assert bool(jnp.all(jnp.isfinite(out)))
    assert bool(jnp.all(out >= 0.0))   # final relu
    print("KERNEL_OK")
</pallas_src>

<mosaic_0001>
module attributes {stable_mosaic.version = 11 : i64} {
  func.func @l3_feast_kernel(%arg0: i32, %arg1: memref<1x2x128xi32, #tpu.memory_space<vmem>>, %arg2: memref<1x32x4xf32, #tpu.memory_space<vmem>>, %arg3: memref<4x512xbf16, #tpu.memory_space<vmem>>, %arg4: memref<1x512xf32, #tpu.memory_space<vmem>>, %arg5: memref<512x256xbf16, #tpu.memory_space<vmem>>, %arg6: memref<1x256xf32, #tpu.memory_space<vmem>>, %arg7: memref<256x128xbf16, #tpu.memory_space<vmem>>, %arg8: memref<1x128xf32, #tpu.memory_space<vmem>>, %arg9: memref<1x32x128xf32, #tpu.memory_space<vmem>>) attributes {dimension_semantics = [#tpu.dimension_semantics<parallel>], iteration_bounds = array<i64: 2>, scalar_prefetch = 0 : i64, scratch_operands = 0 : i64, tpu.core_type = #tpu.core_type<tc>, window_params = [{transform_indices = @transform_0, window_bounds = array<i64: 1, 2, 128>}, {transform_indices = @transform_1, window_bounds = array<i64: 1, 32, 4>}, {pipeline_mode = #tpu.pipeline_mode<synchronous>, transform_indices = @transform_2, window_bounds = array<i64: 4, 512>}, {pipeline_mode = #tpu.pipeline_mode<synchronous>, transform_indices = @transform_3, window_bounds = array<i64: 1, 512>}, {pipeline_mode = #tpu.pipeline_mode<synchronous>, transform_indices = @transform_4, window_bounds = array<i64: 512, 256>}, {pipeline_mode = #tpu.pipeline_mode<synchronous>, transform_indices = @transform_5, window_bounds = array<i64: 1, 256>}, {pipeline_mode = #tpu.pipeline_mode<synchronous>, transform_indices = @transform_6, window_bounds = array<i64: 256, 128>}, {pipeline_mode = #tpu.pipeline_mode<synchronous>, transform_indices = @transform_7, window_bounds = array<i64: 1, 128>}, {transform_indices = @transform_8, window_bounds = array<i64: 1, 32, 128>}]} {
    %c0 = arith.constant 0 : index
    %c0_0 = arith.constant 0 : index
    %c0_1 = arith.constant 0 : index
    %0 = vector.load %arg1[%c0, %c0_0, %c0_1] : memref<1x2x128xi32, #tpu.memory_space<vmem>>, vector<1x2x128xi32>
    %1 = vector.shape_cast %0 : vector<1x2x128xi32> to vector<2x128xi32>
    %2 = vector.extract_strided_slice %1 {offsets = [0, 0], sizes = [1, 128], strides = [1, 1]} : vector<2x128xi32> to vector<1x128xi32>
    %3 = vector.extract_strided_slice %1 {offsets = [1, 0], sizes = [1, 128], strides = [1, 1]} : vector<2x128xi32> to vector<1x128xi32>
    %4 = tpu.iota {dimensions = array<i32: 0>} : vector<32x128xi32>
    %5 = arith.cmpi ne, %2, %3 : vector<1x128xi32>
    %6 = vector.broadcast %3 : vector<1x128xi32> to vector<32x128xi32>
    %7 = arith.cmpi eq, %4, %6 : vector<32x128xi32>
    %8 = arith.extui %7 : vector<32x128xi1> to vector<32x128xi32>
    %9 = arith.sitofp %8 : vector<32x128xi32> to vector<32x128xf32>
    %10 = arith.truncf %9 : vector<32x128xf32> to vector<32x128xbf16>
    %11 = vector.broadcast %2 : vector<1x128xi32> to vector<32x128xi32>
    %12 = arith.cmpi eq, %4, %11 : vector<32x128xi32>
    %13 = vector.broadcast %5 : vector<1x128xi1> to vector<32x128xi1>
    %14 = arith.andi %12, %13 : vector<32x128xi1>
    %15 = arith.extui %14 : vector<32x128xi1> to vector<32x128xi32>
    %16 = arith.sitofp %15 : vector<32x128xi32> to vector<32x128xf32>
    %17 = arith.truncf %16 : vector<32x128xf32> to vector<32x128xbf16>
    %cst = arith.constant dense<0.000000e+00> : vector<32x32xf32>
    %18 = tpu.matmul %10, %17, %cst {dimension_numbers = #tpu.dot_dimension_numbers<[1], [1], [0], [0], [0, 0, 1, 0], [], []>} : vector<32x128xbf16>, vector<32x128xbf16>, vector<32x32xf32> -> vector<32x32xf32>
    %19 = tpu.iota {dimensions = array<i32: 0>} : vector<32x32xi32>
    %20 = tpu.iota {dimensions = array<i32: 1>} : vector<32x32xi32>
    %21 = arith.cmpi eq, %19, %20 : vector<32x32xi32>
    %22 = arith.extui %21 : vector<32x32xi1> to vector<32x32xi32>
    %23 = arith.sitofp %22 : vector<32x32xi32> to vector<32x32xf32>
    %24 = arith.addf %18, %23 : vector<32x32xf32>
    %cst_2 = arith.constant dense<0.000000e+00> : vector<32xf32>
    %25 = vector.multi_reduction <add>, %24, %cst_2 [1] : vector<32x32xf32> to vector<32xf32>
    %26 = vector.shape_cast %25 : vector<32xf32> to vector<32x1xf32>
    %27 = tpu.reciprocal %26 {approx = true} : vector<32x1xf32> -> vector<32x1xf32>
    %28 = arith.truncf %24 : vector<32x32xf32> to vector<32x32xbf16>
    %c0_3 = arith.constant 0 : index
    %c0_4 = arith.constant 0 : index
    %c0_5 = arith.constant 0 : index
    %29 = vector.load %arg2[%c0_3, %c0_4, %c0_5] : memref<1x32x4xf32, #tpu.memory_space<vmem>>, vector<1x32x4xf32>
    %30 = vector.shape_cast %29 : vector<1x32x4xf32> to vector<32x4xf32>
    %c0_6 = arith.constant 0 : index
    %c0_7 = arith.constant 0 : index
    %31 = vector.load %arg3[%c0_6, %c0_7] : memref<4x512xbf16, #tpu.memory_space<vmem>>, vector<4x512xbf16>
    %32 = arith.truncf %30 : vector<32x4xf32> to vector<32x4xbf16>
    %cst_8 = arith.constant dense<0.000000e+00> : vector<32x512xf32>
    %33 = tpu.matmul %32, %31, %cst_8 {dimension_numbers = #tpu.dot_dimension_numbers<[1], [0], [0], [1], [0, 0, 1, 1], [], []>} : vector<32x4xbf16>, vector<4x512xbf16>, vector<32x512xf32> -> vector<32x512xf32>
    %34 = arith.truncf %33 : vector<32x512xf32> to vector<32x512xbf16>
    %cst_9 = arith.constant dense<0.000000e+00> : vector<32x512xf32>
    %35 = tpu.matmul %28, %34, %cst_9 {dimension_numbers = #tpu.dot_dimension_numbers<[1], [0], [0], [1], [0, 0, 1, 1], [], []>} : vector<32x32xbf16>, vector<32x512xbf16>, vector<32x512xf32> -> vector<32x512xf32>
    %36 = vector.broadcast %27 : vector<32x1xf32> to vector<32x512xf32>
    %37 = arith.mulf %36, %35 : vector<32x512xf32>
    %c0_10 = arith.constant 0 : index
    %c0_11 = arith.constant 0 : index
    %38 = vector.load %arg4[%c0_10, %c0_11] : memref<1x512xf32, #tpu.memory_space<vmem>>, vector<1x512xf32>
    %39 = vector.broadcast %38 : vector<1x512xf32> to vector<32x512xf32>
    %40 = arith.addf %37, %39 : vector<32x512xf32>
    %cst_12 = arith.constant 0.000000e+00 : f32
    %41 = vector.broadcast %cst_12 : f32 to vector<32x512xf32>
    %42 = arith.maximumf %40, %41 : vector<32x512xf32>
    %c0_13 = arith.constant 0 : index
    %c0_14 = arith.constant 0 : index
    %43 = vector.load %arg5[%c0_13, %c0_14] : memref<512x256xbf16, #tpu.memory_space<vmem>>, vector<512x256xbf16>
    %44 = arith.truncf %42 : vector<32x512xf32> to vector<32x512xbf16>
    %cst_15 = arith.constant dense<0.000000e+00> : vector<32x512xf32>
    %45 = tpu.matmul %28, %44, %cst_15 {dimension_numbers = #tpu.dot_dimension_numbers<[1], [0], [0], [1], [0, 0, 1, 1], [], []>} : vector<32x32xbf16>, vector<32x512xbf16>, vector<32x512xf32> -> vector<32x512xf32>
    %46 = vector.broadcast %27 : vector<32x1xf32> to vector<32x512xf32>
    %47 = arith.mulf %46, %45 : vector<32x512xf32>
    %48 = arith.truncf %47 : vector<32x512xf32> to vector<32x512xbf16>
    %cst_16 = arith.constant dense<0.000000e+00> : vector<32x256xf32>
    %49 = tpu.matmul %48, %43, %cst_16 {dimension_numbers = #tpu.dot_dimension_numbers<[1], [0], [0], [1], [0, 0, 1, 1], [], []>} : vector<32x512xbf16>, vector<512x256xbf16>, vector<32x256xf32> -> vector<32x256xf32>
    %c0_17 = arith.constant 0 : index
    %c0_18 = arith.constant 0 : index
    %50 = vector.load %arg6[%c0_17, %c0_18] : memref<1x256xf32, #tpu.memory_space<vmem>>, vector<1x256xf32>
    %51 = vector.broadcast %50 : vector<1x256xf32> to vector<32x256xf32>
    %52 = arith.addf %49, %51 : vector<32x256xf32>
    %cst_19 = arith.constant 0.000000e+00 : f32
    %53 = vector.broadcast %cst_19 : f32 to vector<32x256xf32>
    %54 = arith.maximumf %52, %53 : vector<32x256xf32>
    %c0_20 = arith.constant 0 : index
    %c0_21 = arith.constant 0 : index
    %55 = vector.load %arg7[%c0_20, %c0_21] : memref<256x128xbf16, #tpu.memory_space<vmem>>, vector<256x128xbf16>
    %56 = arith.truncf %54 : vector<32x256xf32> to vector<32x256xbf16>
    %cst_22 = arith.constant dense<0.000000e+00> : vector<32x256xf32>
    %57 = tpu.matmul %28, %56, %cst_22 {dimension_numbers = #tpu.dot_dimension_numbers<[1], [0], [0], [1], [0, 0, 1, 1], [], []>} : vector<32x32xbf16>, vector<32x256xbf16>, vector<32x256xf32> -> vector<32x256xf32>
    %58 = vector.broadcast %27 : vector<32x1xf32> to vector<32x256xf32>
    %59 = arith.mulf %58, %57 : vector<32x256xf32>
    %60 = arith.truncf %59 : vector<32x256xf32> to vector<32x256xbf16>
    %cst_23 = arith.constant dense<0.000000e+00> : vector<32x128xf32>
    %61 = tpu.matmul %60, %55, %cst_23 {dimension_numbers = #tpu.dot_dimension_numbers<[1], [0], [0], [1], [0, 0, 1, 1], [], []>} : vector<32x256xbf16>, vector<256x128xbf16>, vector<32x128xf32> -> vector<32x128xf32>
    %c0_24 = arith.constant 0 : index
    %c0_25 = arith.constant 0 : index
    %62 = vector.load %arg8[%c0_24, %c0_25] : memref<1x128xf32, #tpu.memory_space<vmem>>, vector<1x128xf32>
    %63 = vector.broadcast %62 : vector<1x128xf32> to vector<32x128xf32>
    %64 = arith.addf %61, %63 : vector<32x128xf32>
    %cst_26 = arith.constant 0.000000e+00 : f32
    %65 = vector.broadcast %cst_26 : f32 to vector<32x128xf32>
    %66 = arith.maximumf %64, %65 : vector<32x128xf32>
    %c0_27 = arith.constant 0 : index
    %c0_28 = arith.constant 0 : index
    %c0_29 = arith.constant 0 : index
    %67 = vector.load %arg9[%c0_27, %c0_28, %c0_29] : memref<1x32x128xf32, #tpu.memory_space<vmem>>, vector<1x32x128xf32>
    %68 = vector.shape_cast %67 : vector<1x32x128xf32> to vector<32x128xf32>
    %69 = vector.shape_cast %66 : vector<32x128xf32> to vector<1x32x128xf32>
    tpu.vector_store %arg9[%c0_27, %c0_28, %c0_29], %69 {strides = array<i32>} : memref<1x32x128xf32, #tpu.memory_space<vmem>>, vector<1x32x128xf32>,
    return
  }
  func.func @transform_0(%arg0: i32) -> (i32, i32, i32) {
    %c0_i32 = arith.constant 0 : i32
    %c0_i32_0 = arith.constant 0 : i32
    %c0_i32_1 = arith.constant 0 : i32
    return %arg0, %c0_i32, %c0_i32_0 : i32, i32, i32
  }
  func.func @transform_1(%arg0: i32) -> (i32, i32, i32) {
    %c0_i32 = arith.constant 0 : i32
    %c0_i32_0 = arith.constant 0 : i32
    %c0_i32_1 = arith.constant 0 : i32
    return %arg0, %c0_i32, %c0_i32_0 : i32, i32, i32
  }
  func.func @transform_2(%arg0: i32) -> (i32, i32) {
    %c0_i32 = arith.constant 0 : i32
    %c0_i32_0 = arith.constant 0 : i32
    %c0_i32_1 = arith.constant 0 : i32
    return %c0_i32, %c0_i32_0 : i32, i32
  }
  func.func @transform_3(%arg0: i32) -> (i32, i32) {
    %c0_i32 = arith.constant 0 : i32
    %c0_i32_0 = arith.constant 0 : i32
    %c0_i32_1 = arith.constant 0 : i32
    return %c0_i32, %c0_i32_0 : i32, i32
  }
  func.func @transform_4(%arg0: i32) -> (i32, i32) {
    %c0_i32 = arith.constant 0 : i32
    %c0_i32_0 = arith.constant 0 : i32
    %c0_i32_1 = arith.constant 0 : i32
    return %c0_i32, %c0_i32_0 : i32, i32
  }
  func.func @transform_5(%arg0: i32) -> (i32, i32) {
    %c0_i32 = arith.constant 0 : i32
    %c0_i32_0 = arith.constant 0 : i32
    %c0_i32_1 = arith.constant 0 : i32
    return %c0_i32, %c0_i32_0 : i32, i32
  }
  func.func @transform_6(%arg0: i32) -> (i32, i32) {
    %c0_i32 = arith.constant 0 : i32
    %c0_i32_0 = arith.constant 0 : i32
    %c0_i32_1 = arith.constant 0 : i32
    return %c0_i32, %c0_i32_0 : i32, i32
  }
  func.func @transform_7(%arg0: i32) -> (i32, i32) {
    %c0_i32 = arith.constant 0 : i32
    %c0_i32_0 = arith.constant 0 : i32
    %c0_i32_1 = arith.constant 0 : i32
    return %c0_i32, %c0_i32_0 : i32, i32
  }
  func.func @transform_8(%arg0: i32) -> (i32, i32, i32) {
    %c0_i32 = arith.constant 0 : i32
    %c0_i32_0 = arith.constant 0 : i32
    %c0_i32_1 = arith.constant 0 : i32
    return %arg0, %c0_i32, %c0_i32_0 : i32, i32, i32
  }
}

</mosaic_0001>

<bundles_post_ra>
// kernel: l3_feast_forward.1
= control target key start
LH: loop header
LB: loop body
LE: loop exit
PB: predicated region body
PF: predicated region fallthrough
CT: control target
= control target key end

     0   :  { %13 = vsyncpa [#allocation3], 0  ;;  %s2530_s0 = inlined_call_operand.vmem [shape: s32[2,2,128], index: 0, kind: input, shape index: {}]   ;;  %s2531_s1 = inlined_call_operand.vmem [shape: f32[2,32,4], index: 1, kind: input, shape index: {}]   ;;  %s2532_s2 = inlined_call_operand.vmem [shape: bf16[4,512], index: 2, kind: input, shape index: {}]   ;;  %s2533_s3 = inlined_call_operand.vmem [shape: f32[1,512], index: 3, kind: input, shape index: {}]   ;;  %s2534_s4 = inlined_call_operand.hbm [shape: bf16[512,256], index: 4, kind: input, shape index: {}]   ;;  %s2535_s5 = inlined_call_operand.vmem [shape: f32[1,256], index: 5, kind: input, shape index: {}]   ;;  %s2536_s6 = inlined_call_operand.hbm [shape: bf16[256,128], index: 6, kind: input, shape index: {}]   ;;  %s2537_s7 = inlined_call_operand.vmem [shape: f32[1,128], index: 7, kind: input, shape index: {}]   ;;  %s2538_s8 = inlined_call_operand.vmem [shape: f32[2,32,128], index: 8, kind: output, shape index: {}]  }
   0x1   :  { %14 = vsyncpa [#allocation5], 0  ;;  %s2285_s27 = smov 0  }
   0x2 LB: > { %s2230_s28 = smov [#allocation2]   ;;  %s2291_s30 = sadd.s32 4294967295, %s2228_s27   ;;  %s2228_s27 = sphi %s2285_s27, %s20_s27  }
   0x3   : > { %s247_s29 = sshll.u32 %s2230_s28, 4  ;;  %p1831_p0 = scmp.ge.s32.totalorder %s2228_s27, 1  ;;  %s248_s29 = int_to_ptr.vmem [resolvable:$true] %s247_s29 }
   0x4   : > { %p229_p1 = scmp.lt.s32.totalorder %s2228_s27, 3  ;;  %p2019_p3 = scmp.eq.s32.totalorder %s2291_s30, 0 }
   0x5   : > { %s2231_s10 = smov [#allocation4]   ;;  %s2173_s13 = scalar_lea.vmem %s248_s29, 8192 }
   0x6   : > { %p2295_p2 = pnand %p1831_p0, %p229_p1  ;;  %s263_s11 = sshll.u32 %s2231_s10, 4  ;;  %s264_s11 = int_to_ptr.vmem [resolvable:$true] %s263_s11 }
   0x7   : > { %p2174_p7 = scmp.ne.s32.totalorder %s248_s29, %s2173_s13  ;;  %p2181_p10 = scmp.lt.s32.totalorder %s248_s29, %s248_s29 }
   0x8   : > { %p2012_p4 = pneg %p2295_p2  ;;  %p2182_p11 = scmp.lt.s32.totalorder %s2173_s13, %s2173_s13 }
   0xa   : > { %p2304_p5 = pnand %p2019_p3, %p2012_p4  ;;  %p2183_p12 = por %p2182_p11, %p2181_p10 }
   0xc   : > { %p2164_p6 = pneg %p2304_p5 }
   0xe   : > { %p2176_p8 = pnand %p2174_p7, %p2164_p6 }
  0x10   : > { %p2177_p9 = pneg %p2176_p8 }
  0x12   : > { %p2184_p13 = pnand %p2183_p12, %p2177_p9 }
  0x14   : > { %2187 = shalt.err (!%p2184_p13)
}
  0x15   : > { %s2232_s14 = smov 128   ;;  %s2233_s15 = smov 8  }
  0x16   : > { %2015 = dma.hbm_to_vmem [thread:$0]  (!%p2304_p5), %s2534_s4, 8192, %s248_s29, [#allocation3], %s2232_s14, %s2232_s14, %s2233_s15  }
  0x17   : > { %s2199_s18 = scalar_lea.vmem %s264_s11, 2048  ;;  %p2207_p7 = scmp.lt.s32.totalorder %s264_s11, %s264_s11 }
  0x18   : > { %p2200_p0 = scmp.ne.s32.totalorder %s264_s11, %s2199_s18  ;;  %p2208_p8 = scmp.lt.s32.totalorder %s2199_s18, %s2199_s18 }
  0x1a   : > { %p2202_p1 = pnand %p2200_p0, %p2164_p6  ;;  %p2209_p10 = por %p2208_p8, %p2207_p7 }
  0x1c   : > { %p2203_p4 = pneg %p2202_p1 }
  0x1e   : > { %p2210_p9 = pnand %p2209_p10, %p2203_p4 }
  0x20   : > { %2213 = shalt.err (!%p2210_p9)
}
  0x21   : > { %s2234_s19 = smov 64   ;;  %s2235_s20 = smov 4  }
  0x22   : > { %2018 = dma.hbm_to_vmem [thread:$0]  (!%p2304_p5), %s2536_s6, 2048, %s264_s11, [#allocation5], %s2234_s19, %s2234_s19, %s2235_s20  }
  0x23   : > { %297 = sbr.rel (%p2295_p2) target bundleno = 1368 (0x558), region = 52 }
  0x28   : > { %2219 = dma.done.wait (%p2019_p3), [#allocation3], 8192  }
  0x29   : > { %2221 = vsyncadd (%p2019_p3), [#allocation3], 4294959104 }
  0x2a   : > { %2223 = dma.done.wait (%p2019_p3), [#allocation5], 2048  }
  0x2b   : > { %2225 = vsyncadd (%p2019_p3), [#allocation5], 4294965248  ;;  %v355_v0 = vlaneseq  ;;  %p339_p6 = scmp.lt.s32.totalorder %s2291_s30, 1  ;;  %v2236_v1 = vmov 1983009808   ;;  %v2237_v4 = vmov 0  }
  0x2c   : > { %v500_v2 = vunpack.c.l.s4 %v2236_v1  ;;  %620 = vmatprep.mubr.bf16.mxu1 %v2237_v4  ;;  %v494_v9 = vld [vmem:[%s2532_s2] sm:$0xff]  ;;  %vm522_vm0 = vcmask 1041408   ;;  %v2238_v27 = vmov 1.0|1.0   ;;  %vm515_vm9 = vcmask 31744  }
  0x2d   : > { %v2338_v3 = vshrl.u32 %v355_v0, 7  ;;  %s2544_s30 = smov (!%p339_p6, %s2291_s30), 1  ;;  %v498_v12 = vcombine.high %v494_v9, %v494_v9  ;;  %v409_v38 = vand.u32 127, %v355_v0  ;;  %v2239_v43 = vmov 0.0  }
  0x2e   : > { %v501_v5 = vunpack.c.0.s8 %v500_v2  ;;  %s1838_s23 = sshll.u32 %s2544_s30, 1  ;;  %s1962_s24 = sshll.u32 %s2544_s30, 5 }
  0x2f   : > { %v2346_v6 = vsub.s32 0, %v2338_v3  ;;  %s342_s28 = scalar_lea.vmem %s2530_s0, %s1838_s23  ;;  %v2353_v7 = vsub.s32 1, %v2338_v3  ;;  %s2361_s10 = scalar_lea.vmem %s2531_s1, %s1962_s24  ;;  %v2367_v11 = vadd.s32 16, %v2338_v3  ;;  %v2371_v15 = vadd.s32 24, %v2338_v3 }
  0x30   : > { %v504_v8 = vsub.s32 %v501_v5, %v2338_v3  ;;  %v354_v10 = vld [vmem:[%s342_s28] sm:$0x3]  ;;  %v491_v17 = vld [vmem:[%s2361_s10 + $0x8] sm:$0xff]  ;;  %v2377_v20 = vadd.s32 8, %v2338_v3  ;;  %v492_v28 = vld [vmem:[%s2361_s10 + $0x10] sm:$0xff]  ;;  %s352_s21 = scalar_lea.vmem %s2538_s8, %s1962_s24 }
  0x31   : > { %v360_v13 = vrot.slane %v354_v10, 1  ;;  %v383_v14 = vrot.slane %v354_v10, %v2346_v6  ;;  %v490_v16 = vld [vmem:[%s2361_s10] sm:$0xff]  ;;  %v365_v18 = vrot.slane %v354_v10, %v2353_v7  ;;  %v493_v29 = vld [vmem:[%s2361_s10 + $0x18] sm:$0xff] }
  0x32   : > { %v512_v19 = vrot.slane %v498_v12, %v504_v8  ;;  %v495_v26 = vpack.c.bf16 %v491_v17, %v490_v16  ;;  %v505_v30 = vrot.slane %v494_v9, %v504_v8  ;;  %v496_v31 = vpack.c.bf16 %v493_v29, %v492_v28 }
  0x33   : > { %vm361_vm1 = vcmp.ne.s32.totalorder %v354_v10, %v360_v13  ;;  %vm386_vm2 = vcmp.eq.s32.totalorder %v2367_v11, %v383_v14  ;;  %vm366_vm3 = vcmp.eq.s32.totalorder %v2338_v3, %v365_v18  ;;  %vm367_vm4 = vcmp.eq.s32.totalorder %v2377_v20, %v365_v18 }
  0x34   : > { %v388_v21 = vsel %vm361_vm1, 1, %v2237_v4  ;;  %v514_v22 = vcombine.high %v512_v19, %v512_v19  ;;  %v530_v23 = vsel %vm522_vm0, %v512_v19, 0  ;;  %vm387_vm5 = vcmp.eq.s32.totalorder %v2371_v15, %v383_v14  ;;  %vm1859_vm6 = vmpackc.low %vm367_vm4, %vm366_vm3 }
  0x35   : > { %v392_v24 = vrot.slane %v388_v21, %v2346_v6  ;;  %2000 = vmatprep.mubr.msk.bf16.mxu0 %vm1859_vm6, %v2238_v27  ;;  %vm384_vm10 = vcmp.eq.s32.totalorder %v2338_v3, %v383_v14  ;;  %vm385_vm12 = vcmp.eq.s32.totalorder %v2377_v20, %v383_v14  ;;  %vm369_vm3 = vcmp.eq.s32.totalorder %v2371_v15, %v365_v18 }
  0x36   : > { %1866 = vmatprep.subr.msk.bf16.mxu1 %vm522_vm0, %v514_v22  ;;  %v513_v32 = vcombine.high %v505_v30, %v505_v30  ;;  %v524_v33 = vsel %vm522_vm0, %v505_v30, 0  ;;  %vm413_vm6 = vcmp.eq.s32.totalorder %v2371_v15, %v409_v38  ;;  %v789_v28 = vsub.s32 2, %v2338_v3 }
  0x37   : > { %vm2387_vm7 = vcmp.eq.s32.totalorder %v392_v24, 1  ;;  %603 = vmatpush1.bf16.msra.mxu1 %v530_v23  ;;  %v1854_v53 = vsel %vm413_vm6, 1.0, %v2239_v43  ;;  %v793_v29 = vsub.s32 3, %v2338_v3 }
  0x38   : > { %vm396_vm8 = vmand %vm386_vm2, %vm2387_vm7  ;;  %vm368_vm2 = vcmp.eq.s32.totalorder %v2367_v11, %v365_v18 }
  0x39   : > { %vm397_vm11 = vmand %vm387_vm5, %vm2387_vm7  ;;  %vm410_vm5 = vcmp.eq.s32.totalorder %v2338_v3, %v409_v38 }
  0x3a   : > { %vm1855_vm13 = vmpackc.low %vm397_vm11, %vm396_vm8  ;;  %1867 = vmatmul.mubr.msk.bf16.vlgmr.msra.gmra.mxu1 %vm515_vm9, %v495_v26  ;;  %v1851_v49 = vsel %vm410_vm5, 1.0, %v2239_v43  ;;  %vm411_vm8 = vcmp.eq.s32.totalorder %v2377_v20, %v409_v38 }
  0x3b   : > { %1996 = vmatprep.subr.msk.bf16.mxu0 %vm1855_vm13, %v2238_v27  ;;  %vm394_vm14 = vmand %vm384_vm10, %vm2387_vm7  ;;  %630 = vmatprep.mubr.bf16.mxu1 %v2237_v4  ;;  %v1852_v57 = vsel %vm411_vm8, 1.0, %v2239_v43 }
  0x3c   : > { %1997 = vmatpush3.bf16.xpose.msk.msra.mxu0 %vm1855_vm13, %v2238_v27  ;;  %vm395_vm15 = vmand %vm385_vm12, %vm2387_vm7  ;;  %vm471_vm7 = vcmask 261120  }
  0x3d   : > { %vm1857_vm1 = vmpackc.low %vm395_vm15, %vm394_vm14 }
  0x3e   : > { %1998 = vmatprep.subr.msk.bf16.mxu0 %vm1857_vm1, %v2238_v27  ;;  %vm1861_vm4 = vmpackc.low %vm369_vm3, %vm368_vm2 }
  0x42   : > { %1868 = vmatmul.mubr.msk.bf16.gmra.mxu1 %vm515_vm9, %v496_v31 }
  0x43   : > { %740 = vmatprep.mubr.bf16.mxu1 %v2237_v4 }
  0x44   : > { %1999 = vmatpush3.bf16.xpose.msk.msra.mxu0 %vm1857_vm1, %v2238_v27 }
  0x45   : > { %1863 = vmatprep.subr.msk.bf16.mxu0 %vm522_vm0, %v513_v32  ;;  %vm412_vm0 = vcmp.eq.s32.totalorder %v2367_v11, %v409_v38 }
  0x46   : > { %v1853_v44 = vsel %vm412_vm0, 1.0, %v2239_v43 }
  0x4b   : > { %2001 = vmatmul.mubr.msk.bf16.vlgmr.msra.gmra.mxu0 %vm1861_vm4, %v2238_v27 }
  0x4c   : > { %550 = vmatpush1.bf16.msra.mxu0 %v524_v33  ;;  %567 = vmatprep.mubr.bf16.mxu0 %v2237_v4 }
  0x53   : > { %1864 = vmatmul.mubr.msk.bf16.vlgmr.msra.gmra.mxu0 %vm515_vm9, %v495_v26 }
  0x54   : > { %577 = vmatprep.mubr.bf16.mxu0 %v2237_v4 }
  0x5b   : > { %1865 = vmatmul.mubr.msk.bf16.gmra.mxu0 %vm515_vm9, %v496_v31  ;;  %v777_v31 = vld [vmem:[%s2533_s3] sm:$0xf] }
  0x5c   : > { %687 = vmatprep.mubr.bf16.mxu0 %v2237_v4 }
  0xfa   : > { %v622_v34 = vpop.f32.mrf.mxu1 }
  0xfc   : > { %v624_v35 = vpop.f32.mrf.mxu1 }
  0xfe   : > { %v626_v36 = vpop.f32.mrf.mxu1 }
  0xff   : > { %v643_v51 = vpack.c.bf16 %v626_v36, %v622_v34 }
 0x100   : > { %v628_v37 = vpop.f32.mrf.mxu1 }
 0x101   : > { %v644_v46 = vpack.c.bf16 %v628_v37, %v624_v35 }
 0x102   : > { %v632_v39 = vpop.f32.mrf.mxu1 }
 0x104   : > { %v634_v40 = vpop.f32.mrf.mxu1 }
 0x106   : > { %v636_v41 = vpop.f32.mrf.mxu1 }
 0x107   : > { %v647_v42 = vpack.c.bf16 %v636_v41, %v632_v39  ;;  %v790_v39 = vrot.slane %v777_v31, %v789_v28 }
 0x108   : > { %v638_v45 = vpop.f32.mrf.mxu1 }
 0x109   : > { %v648_v47 = vpack.c.bf16 %v638_v45, %v634_v40  ;;  %v794_v40 = vrot.slane %v777_v31, %v793_v29 }
 0x10b   : > { %v2002_v48 = vpop.f32.mrf.mxu0  ;;  %720 = vmatprep.subr.bf16.mxu1 %v648_v47 }
 0x10c   : > { %v465_v50 = vadd.f32 %v2002_v48, %v1853_v44  ;;  %721 = vmatpush1.bf16.msra.mxu1 %v647_v42 }
 0x10d   : > { %v456_v52 = vpop.f32.mrf.mxu0  ;;  %722 = vmatprep.subr.bf16.mxu1 %v644_v46 }
 0x10e   : > { %v457_v54 = vadd.f32 %v1851_v49, %v456_v52  ;;  %v478_v55 = vsel %vm471_vm7, %v465_v50, 0.0 }
 0x10f   : > { %479 = vadd.xlane.f32.xlu0 %v478_v55  ;;  %v2003_v56 = vpop.f32.mrf.mxu0 }
 0x110   : > { %v468_v58 = vadd.f32 %v2003_v56, %v1854_v53  ;;  %v472_v59 = vsel %vm471_vm7, %v457_v54, 0.0  ;;  %723 = vmatpush1.bf16.msra.mxu1 %v643_v51 }
 0x111   : > { %v459_v60 = vpop.f32.mrf.mxu0  ;;  %473 = vadd.xlane.f32.xlu1 %v472_v59 }
 0x112   : > { %v460_v61 = vadd.f32 %v1852_v57, %v459_v60  ;;  %v481_v62 = vsel %vm471_vm7, %v468_v58, 0.0  ;;  %v2432_v10 = vpack.c.bf16 %v468_v58, %v465_v50 }
 0x113   : > { %482 = vadd.xlane.f32.xlu0 %v481_v62  ;;  %v569_v63 = vpop.f32.mrf.mxu0 }
 0x114   : > { %v2426_v0 = vpack.c.bf16 %v460_v61, %v457_v54  ;;  %v475_v1 = vsel %vm471_vm7, %v460_v61, 0.0 }
 0x115   : > { %v571_v2 = vpop.f32.mrf.mxu0  ;;  %476 = vadd.xlane.f32.xlu1 %v475_v1 }
 0x116   : > { %1871 = vmatmul.mubr.msk.bf16.vlgmr.msra.gmra.mxu1 %vm471_vm7, %v2426_v0 }
 0x117   : > { %v573_v5 = vpop.f32.mrf.mxu0  ;;  %750 = vmatprep.mubr.bf16.mxu1 %v2237_v4 }
 0x118   : > { %v641_v17 = vpack.c.bf16 %v573_v5, %v569_v63 }
 0x119   : > { %v575_v8 = vpop.f32.mrf.mxu0 }
 0x11a   : > { %v642_v16 = vpack.c.bf16 %v575_v8, %v571_v2  ;;  %v2044_v8 = vld [vmem:[#allocation2 + $0x174] ss:$8 sps:$4 sm:$0xff]  }
 0x11b   : > { %v579_v9 = vpop.f32.mrf.mxu0 }
 0x11d   : > { %v581_v11 = vpop.f32.mrf.mxu0 }
 0x11e   : > { %1872 = vmatmul.mubr.msk.bf16.gmra.mxu1 %vm471_vm7, %v2432_v10 }
 0x11f   : > { %v583_v12 = vpop.f32.mrf.mxu0  ;;  %988 = vmatprep.mubr.bf16.mxu1 %v2237_v4 }
 0x120   : > { %v645_v15 = vpack.c.bf16 %v583_v12, %v579_v9 }
 0x121   : > { %v585_v13 = vpop.f32.mrf.mxu0 }
 0x122   : > { %v646_v14 = vpack.c.bf16 %v585_v13, %v581_v11  ;;  %v2042_v13 = vld [vmem:[#allocation2 + $0x170] ss:$8 sps:$4 sm:$0xff]  }
 0x124   : > { %667 = vmatprep.subr.bf16.mxu0 %v646_v14  ;;  %v2047_v14 = vld [vmem:[#allocation2 + $0x164] ss:$8 sps:$4 sm:$0xff]  }
 0x125   : > { %668 = vmatpush1.bf16.msra.mxu0 %v645_v15 }
 0x126   : > { %669 = vmatprep.subr.bf16.mxu0 %v642_v16 }
 0x129   : > { %670 = vmatpush1.bf16.msra.mxu0 %v641_v17  ;;  %v2045_v17 = vld [vmem:[#allocation2 + $0x160] ss:$8 sps:$4 sm:$0xff]  }
 0x12c   : > { %1869 = vmatmul.mubr.msk.bf16.vlgmr.msra.gmra.mxu0 %vm471_vm7, %v2426_v0 }
 0x12d   : > { %697 = vmatprep.mubr.bf16.mxu0 %v2237_v4 }
 0x134   : > { %1870 = vmatmul.mubr.msk.bf16.gmra.mxu0 %vm471_vm7, %v2432_v10 }
 0x135   : > { %935 = vmatprep.mubr.bf16.mxu0 %v2237_v4 }
 0x198   : > { %v480_v19 = vpop.xlane.xlu0 %479 }
 0x199   : > { %2154 = vrcp.f32 %v480_v19 }
 0x19a   : > { %v474_v18 = vpop.xlane.xlu1 %473 }
 0x19c   : > { %v483_v21 = vpop.xlane.xlu0 %482 }
 0x19e   : > { %v477_v20 = vpop.xlane.xlu1 %476 }
 0x19f   : > { %2156 = vrcp.f32 %v477_v20  ;;  %v2050_v20 = vld [vmem:[#allocation2 + $0x154] ss:$8 sps:$4 sm:$0xff]  }
 0x1a0   : > { %2158 = vrcp.f32 %v474_v18 }
 0x1a1   : > { %2160 = vrcp.f32 %v483_v21 }
 0x1a6   : > { %v2443_v27 = vpop.eup %2154 }
 0x1ac   : > { %v2447_v30 = vpop.eup %2156 }
 0x1ad   : > { %v2452_v33 = vpop.eup %2158 }
 0x1ae   : > { %v2456_v36 = vpop.eup %2160 }
 0x1d6   : > { %v742_v22 = vpop.f32.mrf.mxu1 }
 0x1d7   : > { %v763_v48 = vmul.f32 %v2452_v33, %v742_v22 }
 0x1d8   : > { %v744_v23 = vpop.f32.mrf.mxu1 }
 0x1d9   : > { %v764_v3 = vmul.f32 %v2452_v33, %v744_v23  ;;  %v801_v57 = vadd.f32 %v790_v39, %v763_v48  ;;  %v782_v23 = vrot.slane %v777_v31, %v2346_v6  ;;  %v2056_v48 = vld [vmem:[#allocation2 + $0x134] ss:$8 sps:$4 sm:$0xff]  }
 0x1da   : > { %v746_v24 = vpop.f32.mrf.mxu1 }
 0x1db   : > { %v767_v42 = vmul.f32 %v2447_v30, %v746_v24  ;;  %v802_v50 = vadd.f32 %v794_v40, %v764_v3  ;;  %v817_v2 = vmax.f32 %v801_v57, 0.0  ;;  %v2059_v57 = vld [vmem:[#allocation2 + $0x124] ss:$8 sps:$4 sm:$0xff]  }
 0x1dc   : > { %v748_v25 = vpop.f32.mrf.mxu1 }
 0x1dd   : > { %v768_v34 = vmul.f32 %v2447_v30, %v748_v25  ;;  %v805_v52 = vadd.f32 %v790_v39, %v767_v42  ;;  %v818_v59 = vmax.f32 %v802_v50, 0.0  ;;  %v786_v25 = vrot.slane %v777_v31, %v2353_v7 }
 0x1de   : > { %v752_v26 = vpop.f32.mrf.mxu1 }
 0x1df   : > { %v771_v37 = vmul.f32 %v2443_v27, %v752_v26  ;;  %v806_v44 = vadd.f32 %v794_v40, %v768_v34  ;;  %v821_v61 = vmax.f32 %v805_v52, 0.0 }
 0x1e0   : > { %v754_v32 = vpop.f32.mrf.mxu1 }
 0x1e1   : > { %v772_v35 = vmul.f32 %v2443_v27, %v754_v32  ;;  %v809_v49 = vadd.f32 %v790_v39, %v771_v37  ;;  %v822_v54 = vmax.f32 %v806_v44, 0.0  ;;  %v897_v9 = vpack.c.bf16 %v821_v61, %v817_v2  ;;  %v2048_v32 = vld [vmem:[#allocation2 + $0x150] ss:$8 sps:$4 sm:$0xff]   ;;  %v2051_v44 = vld [vmem:[#allocation2 + $0x140] ss:$8 sps:$4 sm:$0xff]  }
 0x1e2   : > { %v756_v38 = vpop.f32.mrf.mxu1  ;;  %v2057_v61 = vld [vmem:[#allocation2 + $0x120] ss:$8 sps:$4 sm:$0xff]   ;;  %v2063_v2 = vld [vmem:[#allocation2 + $0x110] ss:$8 sps:$4 sm:$0xff]  }
 0x1e3   : > { %v775_v41 = vmul.f32 %v2456_v36, %v756_v38  ;;  %v810_v45 = vadd.f32 %v794_v40, %v772_v35  ;;  %v825_v58 = vmax.f32 %v809_v49, 0.0  ;;  %v898_v1 = vpack.c.bf16 %v822_v54, %v818_v59  ;;  %v2062_v59 = vld [vmem:[#allocation2 + $0x74] ss:$8 sps:$4 sm:$0xff]  }
 0x1e4   : > { %v758_v43 = vpop.f32.mrf.mxu1 }
 0x1e5   : > { %v813_v46 = vadd.f32 %v790_v39, %v775_v41  ;;  %v776_v47 = vmul.f32 %v2456_v36, %v758_v43  ;;  %v826_v55 = vmax.f32 %v810_v45, 0.0  ;;  %v2053_v39 = vld [vmem:[#allocation2 + $0x144] ss:$8 sps:$4 sm:$0xff]  }
 0x1e7   : > { %v814_v51 = vadd.f32 %v794_v40, %v776_v47  ;;  %v829_v53 = vmax.f32 %v813_v46, 0.0 }
 0x1e9   : > { %v830_v56 = vmax.f32 %v814_v51, 0.0  ;;  %v901_v62 = vpack.c.bf16 %v829_v53, %v825_v58 }
 0x1eb   : > { %v902_v60 = vpack.c.bf16 %v830_v56, %v826_v55  ;;  %v2054_v55 = vld [vmem:[#allocation2 + $0x130] ss:$8 sps:$4 sm:$0xff]  }
 0x1ec   : > { %v689_v63 = vpop.f32.mrf.mxu0 }
 0x1ed   : > { %968 = vmatprep.subr.bf16.mxu1 %v902_v60  ;;  %v761_v3 = vmul.f32 %v2452_v33, %v689_v63  ;;  %v2060_v63 = vld [vmem:[#allocation2 + $0x70] ss:$8 sps:$4 sm:$0xff]  }
 0x1ee   : > { %v691_v5 = vpop.f32.mrf.mxu0  ;;  %969 = vmatpush1.bf16.msra.mxu1 %v901_v62  ;;  %v2065_v62 = vld [vmem:[#allocation2 + $0x114] ss:$8 sps:$4 sm:$0xff]  }
 0x1ef   : > { %970 = vmatprep.subr.bf16.mxu1 %v898_v1  ;;  %v762_v24 = vmul.f32 %v2452_v33, %v691_v5  ;;  %v799_v49 = vadd.f32 %v782_v23, %v761_v3  ;;  %v2068_v1 = vld [vmem:[#allocation2 + $0x64] ss:$8 sps:$4 sm:$0xff]   ;;  %v2110_v3 = vld [vmem:[#allocation2 + $0xf4] ss:$8 sps:$4 sm:$0xff]  }
 0x1f0   : > { %v693_v11 = vpop.f32.mrf.mxu0  ;;  %v2071_v5 = vld [vmem:[#allocation2 + $0x104] ss:$8 sps:$4 sm:$0xff]  }
 0x1f1   : > { %v765_v28 = vmul.f32 %v2447_v30, %v693_v11  ;;  %v800_v41 = vadd.f32 %v786_v25, %v762_v24  ;;  %v815_v58 = vmax.f32 %v799_v49, 0.0  ;;  %v2069_v11 = vld [vmem:[#allocation2 + $0x100] ss:$8 sps:$4 sm:$0xff]   ;;  %v2095_v24 = vld [vmem:[#allocation2 + $0x1c4] ss:$8 sps:$4 sm:$0xff]  }
 0x1f2   : > { %v695_v12 = vpop.f32.mrf.mxu0  ;;  %971 = vmatpush1.bf16.msra.mxu1 %v897_v9  ;;  %v2074_v9 = vld [vmem:[#allocation2 + $0x54] ss:$8 sps:$4 sm:$0xff]   ;;  %v2123_v49 = vld [vmem:[#allocation2 + $0xc0] ss:$8 sps:$4 sm:$0xff]  }
 0x1f3   : > { %1418 = vmatprep.subr.bf16.mxu1 %v2044_v8  ;;  %v766_v18 = vmul.f32 %v2447_v30, %v695_v12  ;;  %v803_v31 = vadd.f32 %v782_v23, %v765_v28  ;;  %v816_v51 = vmax.f32 %v800_v41, 0.0  ;;  %v2066_v8 = vld [vmem:[#allocation2 + $0x60] ss:$8 sps:$4 sm:$0xff]   ;;  %v2077_v12 = vld [vmem:[#allocation2 + $0x1f4] ss:$8 sps:$4 sm:$0xff]  }
 0x1f4   : > { %v699_v15 = vpop.f32.mrf.mxu0  ;;  %v2093_v28 = vld [vmem:[#allocation2 + $0x1c0] ss:$8 sps:$4 sm:$0xff]   ;;  %v2113_v41 = vld [vmem:[#allocation2 + $0x194] ss:$8 sps:$4 sm:$0xff]  }
 0x1f5   : > { %1875 = vmatmul.mubr.msk.bf16.vlgmr.msra.gmra.mxu1 %vm471_vm7, %v2426_v0  ;;  %v769_v21 = vmul.f32 %v2443_v27, %v699_v15  ;;  %v804_v34 = vadd.f32 %v786_v25, %v766_v18  ;;  %v819_v53 = vmax.f32 %v803_v31, 0.0  ;;  %v2075_v15 = vld [vmem:[#allocation2 + $0x1f0] ss:$8 sps:$4 sm:$0xff]   ;;  %v2086_v18 = vld [vmem:[#allocation2 + $0x34] ss:$8 sps:$4 sm:$0xff]  }
 0x1f6   : > { %v701_v16 = vpop.f32.mrf.mxu0  ;;  %998 = vmatprep.mubr.bf16.mxu1 %v2237_v4  ;;  %1419 = vmatpush1.bf16.msra.mxu1 %v2042_v13  ;;  %v2072_v13 = vld [vmem:[#allocation2 + $0x50] ss:$8 sps:$4 sm:$0xff]   ;;  %v2116_v31 = vld [vmem:[#allocation2 + $0xe4] ss:$8 sps:$4 sm:$0xff]  }
 0x1f7   : > { %v770_v19 = vmul.f32 %v2443_v27, %v701_v16  ;;  %1420 = vmatprep.subr.bf16.mxu1 %v2047_v14  ;;  %v807_v40 = vadd.f32 %v782_v23, %v769_v21  ;;  %v820_v45 = vmax.f32 %v804_v34, 0.0  ;;  %v895_v60 = vpack.c.bf16 %v819_v53, %v815_v58  ;;  %v2080_v14 = vld [vmem:[#allocation2 + $0x44] ss:$8 sps:$4 sm:$0xff]   ;;  %v2084_v21 = vld [vmem:[#allocation2 + $0x30] ss:$8 sps:$4 sm:$0xff]  }
 0x1f8   : > { %v703_v22 = vpop.f32.mrf.mxu0  ;;  %v2083_v16 = vld [vmem:[#allocation2 + $0x1e4] ss:$8 sps:$4 sm:$0xff]   ;;  %v2129_v53 = vld [vmem:[#allocation2 + $0xa0] ss:$8 sps:$4 sm:$0xff]  }
 0x1f9   : > { %v773_v26 = vmul.f32 %v2456_v36, %v703_v22  ;;  %v808_v35 = vadd.f32 %v786_v25, %v770_v19  ;;  %v823_v50 = vmax.f32 %v807_v40, 0.0  ;;  %v896_v56 = vpack.c.bf16 %v820_v45, %v816_v51  ;;  %v2081_v19 = vld [vmem:[#allocation2 + $0x1e0] ss:$8 sps:$4 sm:$0xff]   ;;  %v2092_v22 = vld [vmem:[#allocation2 + $0x24] ss:$8 sps:$4 sm:$0xff]  }
 0x1fa   : > { %v705_v29 = vpop.f32.mrf.mxu0  ;;  %1421 = vmatpush1.bf16.msra.mxu1 %v2045_v17  ;;  %v2078_v17 = vld [vmem:[#allocation2 + $0x40] ss:$8 sps:$4 sm:$0xff]   ;;  %v2104_v34 = vld [vmem:[#allocation2 + $0x4] ss:$8 sps:$4 sm:$0xff]   ;;  %v2108_v40 = vld [vmem:[#allocation2 + $0xf0] ss:$8 sps:$4 sm:$0xff]  }
 0x1fb   : > { %v811_v37 = vadd.f32 %v782_v23, %v773_v26  ;;  %v774_v38 = vmul.f32 %v2456_v36, %v705_v29  ;;  %1422 = vmatprep.subr.bf16.mxu1 %v2050_v20  ;;  %v824_v46 = vmax.f32 %v808_v35, 0.0  ;;  %v2089_v20 = vld [vmem:[#allocation2 + $0x1d4] ss:$8 sps:$4 sm:$0xff]   ;;  %v2087_v23 = vld [vmem:[#allocation2 + $0x1d0] ss:$8 sps:$4 sm:$0xff]  }
 0x1fc   : > { %v2098_v26 = vld [vmem:[#allocation2 + $0x14] ss:$8 sps:$4 sm:$0xff]   ;;  %v2099_v35 = vld [vmem:[#allocation2 + $0x1b0] ss:$8 sps:$4 sm:$0xff]   ;;  %v2117_v45 = vld [vmem:[#allocation2 + $0x180] ss:$8 sps:$4 sm:$0xff]  }
 0x1fd   : > { %v812_v42 = vadd.f32 %v786_v25, %v774_v38  ;;  %1876 = vmatmul.mubr.msk.bf16.gmra.mxu1 %vm471_vm7, %v2432_v10  ;;  %v827_v43 = vmax.f32 %v811_v37, 0.0  ;;  %v2090_v25 = vld [vmem:[#allocation2 + $0x20] ss:$8 sps:$4 sm:$0xff]   ;;  %v2101_v29 = vld [vmem:[#allocation2 + $0x1b4] ss:$8 sps:$4 sm:$0xff]  }
 0x1fe   : > { %1423 = vmatpush1.bf16.msra.mxu1 %v2048_v32  ;;  %v2096_v32 = vld [vmem:[#allocation2 + $0x10] ss:$8 sps:$4 sm:$0xff]   ;;  %v2102_v37 = vld [vmem:[#allocation2] ss:$8 sps:$4 sm:$0xff]   ;;  %v2107_v38 = vld [vmem:[#allocation2 + $0x1a4] ss:$8 sps:$4 sm:$0xff]  }
 0x1ff   : > { %v828_v47 = vmax.f32 %v812_v42, 0.0  ;;  %1424 = vmatprep.subr.bf16.mxu1 %v2053_v39  ;;  %v899_v54 = vpack.c.bf16 %v827_v43, %v823_v50  ;;  %v2105_v39 = vld [vmem:[#allocation2 + $0x1a0] ss:$8 sps:$4 sm:$0xff]   ;;  %v2111_v42 = vld [vmem:[#allocation2 + $0x190] ss:$8 sps:$4 sm:$0xff]  }
 0x200   : > { %v2114_v43 = vld [vmem:[#allocation2 + $0xe0] ss:$8 sps:$4 sm:$0xff]   ;;  %v2128_v50 = vld [vmem:[#allocation2 + $0xb4] ss:$8 sps:$4 sm:$0xff]   ;;  %v2126_v51 = vld [vmem:[#allocation2 + $0xb0] ss:$8 sps:$4 sm:$0xff]  }
 0x201   : > { %v900_v52 = vpack.c.bf16 %v828_v47, %v824_v46  ;;  %v2122_v46 = vld [vmem:[#allocation2 + $0xd4] ss:$8 sps:$4 sm:$0xff]   ;;  %v2120_v47 = vld [vmem:[#allocation2 + $0xd0] ss:$8 sps:$4 sm:$0xff]  }
 0x202   : > { %1425 = vmatpush1.bf16.msra.mxu1 %v2051_v44  ;;  %v2119_v44 = vld [vmem:[#allocation2 + $0x184] ss:$8 sps:$4 sm:$0xff]  }
 0x203   : > { %915 = vmatprep.subr.bf16.mxu0 %v900_v52  ;;  %1426 = vmatprep.subr.bf16.mxu1 %v2056_v48  ;;  %v2125_v48 = vld [vmem:[#allocation2 + $0xc4] ss:$8 sps:$4 sm:$0xff]  }
 0x204   : > { %916 = vmatpush1.bf16.msra.mxu0 %v899_v54  ;;  %v2131_v52 = vld [vmem:[#allocation2 + $0xa4] ss:$8 sps:$4 sm:$0xff]   ;;  %v2134_v54 = vld [vmem:[#allocation2 + $0x94] ss:$8 sps:$4 sm:$0xff]  }
 0x205   : > { %917 = vmatprep.subr.bf16.mxu0 %v896_v56  ;;  %v2137_v56 = vld [vmem:[#allocation2 + $0x84] ss:$8 sps:$4 sm:$0xff]  }
 0x206   : > { %1427 = vmatpush1.bf16.msra.mxu1 %v2054_v55  ;;  %v2132_v55 = vld [vmem:[#allocation2 + $0x90] ss:$8 sps:$4 sm:$0xff]  }
 0x207   : > { %1428 = vmatprep.subr.bf16.mxu1 %v2059_v57  ;;  %v2135_v57 = vld [vmem:[#allocation2 + $0x80] ss:$8 sps:$4 sm:$0xff]  }
 0x208   : > { %918 = vmatpush1.bf16.msra.mxu0 %v895_v60 }
 0x209   : > { %1365 = vmatprep.subr.bf16.mxu0 %v2062_v59 }
 0x20a   : > { %1429 = vmatpush1.bf16.msra.mxu1 %v2057_v61 }
 0x20b   : > { %1873 = vmatmul.mubr.msk.bf16.vlgmr.msra.gmra.mxu0 %vm471_vm7, %v2426_v0  ;;  %1430 = vmatprep.subr.bf16.mxu1 %v2065_v62 }
 0x20c   : > { %945 = vmatprep.mubr.bf16.mxu0 %v2237_v4  ;;  %1366 = vmatpush1.bf16.msra.mxu0 %v2060_v63 }
 0x20d   : > { %1367 = vmatprep.subr.bf16.mxu0 %v2068_v1 }
 0x20e   : > { %1431 = vmatpush1.bf16.msra.mxu1 %v2063_v2 }
 0x20f   : > { %1432 = vmatprep.subr.bf16.mxu1 %v2071_v5 }
 0x210   : > { %1368 = vmatpush1.bf16.msra.mxu0 %v2066_v8 }
 0x211   : > { %1369 = vmatprep.subr.bf16.mxu0 %v2074_v9 }
 0x212   : > { %1433 = vmatpush1.bf16.msra.mxu1 %v2069_v11 }
 0x213   : > { %1874 = vmatmul.mubr.msk.bf16.gmra.mxu0 %vm471_vm7, %v2432_v10  ;;  %1434 = vmatprep.subr.bf16.mxu1 %v2077_v12 }
 0x214   : > { %1370 = vmatpush1.bf16.msra.mxu0 %v2072_v13 }
 0x215   : > { %1371 = vmatprep.subr.bf16.mxu0 %v2080_v14 }
 0x216   : > { %1435 = vmatpush2.bf16.msra.mxu1 %v2075_v15 }
 0x217   : > { %1436 = vmatprep.subr.bf16.mxu1 %v2083_v16 }
 0x218   : > { %1372 = vmatpush1.bf16.msra.mxu0 %v2078_v17 }
 0x219   : > { %1373 = vmatprep.subr.bf16.mxu0 %v2086_v18 }
 0x21a   : > { %1437 = vmatpush2.bf16.msra.mxu1 %v2081_v19 }
 0x21b   : > { %1438 = vmatprep.subr.bf16.mxu1 %v2089_v20 }
 0x21c   : > { %1374 = vmatpush1.bf16.msra.mxu0 %v2084_v21 }
 0x21d   : > { %1375 = vmatprep.subr.bf16.mxu0 %v2092_v22 }
 0x21e   : > { %1439 = vmatpush2.bf16.msra.mxu1 %v2087_v23 }
 0x21f   : > { %1440 = vmatprep.subr.bf16.mxu1 %v2095_v24 }
 0x220   : > { %1376 = vmatpush1.bf16.msra.mxu0 %v2090_v25 }
 0x221   : > { %1377 = vmatprep.subr.bf16.mxu0 %v2098_v26 }
 0x222   : > { %1441 = vmatpush2.bf16.msra.mxu1 %v2093_v28 }
 0x223   : > { %1442 = vmatprep.subr.bf16.mxu1 %v2101_v29 }
 0x224   : > { %1378 = vmatpush1.bf16.msra.mxu0 %v2096_v32 }
 0x225   : > { %1379 = vmatprep.subr.bf16.mxu0 %v2104_v34 }
 0x226   : > { %1443 = vmatpush2.bf16.msra.mxu1 %v2099_v35 }
 0x227   : > { %1444 = vmatprep.subr.bf16.mxu1 %v2107_v38 }
 0x228   : > { %1380 = vmatpush1.bf16.msra.mxu0 %v2102_v37 }
 0x229   : > { %1381 = vmatprep.subr.bf16.mxu0 %v2110_v3 }
 0x22a   : > { %1445 = vmatpush2.bf16.msra.mxu1 %v2105_v39 }
 0x22b   : > { %1446 = vmatprep.subr.bf16.mxu1 %v2113_v41 }
 0x22c   : > { %1382 = vmatpush2.bf16.msra.mxu0 %v2108_v40 }
 0x22d   : > { %1383 = vmatprep.subr.bf16.mxu0 %v2116_v31 }
 0x22e   : > { %1447 = vmatpush2.bf16.msra.mxu1 %v2111_v42 }
 0x22f   : > { %1448 = vmatprep.subr.bf16.mxu1 %v2119_v44  ;;  %v2139_v44 = vld [vmem:[#allocation4 + $0x38] sm:$0xff]  }
 0x230   : > { %1384 = vmatpush2.bf16.msra.mxu0 %v2114_v43  ;;  %v2138_v43 = vld [vmem:[#allocation4 + $0x78] sm:$0xff]  }
 0x231   : > { %1385 = vmatprep.subr.bf16.mxu0 %v2122_v46  ;;  %v2141_v46 = vld [vmem:[#allocation4 + $0x30] sm:$0xff]  }
 0x232   : > { %1449 = vmatpush2.bf16.msra.mxu1 %v2117_v45  ;;  %v2140_v45 = vld [vmem:[#allocation4 + $0x70] sm:$0xff]  }
 0x233   : > { %1968 = vmatprep.subr.bf16.mxu1 %v2138_v43  ;;  %v2148_v43 = vld [vmem:[#allocation4 + $0x50] sm:$0xff]  }
 0x234   : > { %1386 = vmatpush2.bf16.msra.mxu0 %v2120_v47  ;;  %v2142_v47 = vld [vmem:[#allocation4 + $0x68] sm:$0xff]  }
 0x235   : > { %1387 = vmatprep.subr.bf16.mxu0 %v2125_v48  ;;  %v2143_v48 = vld [vmem:[#allocation4 + $0x28] sm:$0xff]  }
 0x238   : > { %1388 = vmatpush2.bf16.msra.mxu0 %v2123_v49  ;;  %v2144_v49 = vld [vmem:[#allocation4 + $0x60] sm:$0xff]  }
 0x239   : > { %1389 = vmatprep.subr.bf16.mxu0 %v2128_v50  ;;  %v2145_v50 = vld [vmem:[#allocation4 + $0x20] sm:$0xff]  }
 0x23c   : > { %1390 = vmatpush2.bf16.msra.mxu0 %v2126_v51  ;;  %v2146_v51 = vld [vmem:[#allocation4 + $0x58] sm:$0xff]  }
 0x23d   : > { %1391 = vmatprep.subr.bf16.mxu0 %v2131_v52  ;;  %v2147_v52 = vld [vmem:[#allocation4 + $0x18] sm:$0xff]  }
 0x240   : > { %1392 = vmatpush2.bf16.msra.mxu0 %v2129_v53 }
 0x241   : > { %1393 = vmatprep.subr.bf16.mxu0 %v2134_v54 }
 0x244   : > { %1394 = vmatpush2.bf16.msra.mxu0 %v2132_v55 }
 0x245   : > { %1395 = vmatprep.subr.bf16.mxu0 %v2137_v56 }
 0x248   : > { %1396 = vmatpush2.bf16.msra.mxu0 %v2135_v57 }
 0x2b5   : > { %v990_v58 = vpop.f32.mrf.mxu1 }
 0x2b6   : > { %v1011_v2 = vmul.f32 %v2452_v33, %v990_v58 }
 0x2b7   : > { %v992_v59 = vpop.f32.mrf.mxu1 }
 0x2b8   : > { %v1012_v63 = vmul.f32 %v2452_v33, %v992_v59 }
 0x2b9   : > { %v994_v60 = vpop.f32.mrf.mxu1 }
 0x2ba   : > { %v1015_v61 = vmul.f32 %v2447_v30, %v994_v60 }
 0x2bb   : > { %v996_v62 = vpop.f32.mrf.mxu1 }
 0x2bc   : > { %v1016_v1 = vmul.f32 %v2447_v30, %v996_v62  ;;  %v1027_v9 = vpack.c.bf16 %v1015_v61, %v1011_v2  ;;  %v1033_v62 = vld [vmem:[%s2535_s5] sm:$0x3] }
 0x2bd   : > { %v1000_v5 = vpop.f32.mrf.mxu1  ;;  %v1042_v2 = vrot.slane %v1033_v62, %v2353_v7 }
 0x2be   : > { %v1028_v8 = vpack.c.bf16 %v1016_v1, %v1012_v63  ;;  %v1019_v17 = vmul.f32 %v2443_v27, %v1000_v5  ;;  %v1038_v5 = vrot.slane %v1033_v62, %v2346_v6 }
 0x2bf   : > { %v1002_v11 = vpop.f32.mrf.mxu1 }
 0x2c0   : > { %1450 = vmatprep.mubr.bf16.mxu1 %v1028_v8  ;;  %v1020_v15 = vmul.f32 %v2443_v27, %v1002_v11 }
 0x2c1   : > { %v1004_v12 = vpop.f32.mrf.mxu1  ;;  %1451 = vmatmul.mubr.bf16.vlgmr.msra.gmra.mxu1 %v1027_v9 }
 0x2c2   : > { %v1023_v13 = vmul.f32 %v2456_v36, %v1004_v12  ;;  %1969 = vmatpush3.bf16.msra.mxu1 %v2139_v44  ;;  %v2149_v44 = vld [vmem:[#allocation4 + $0x10] sm:$0xff]  }
 0x2c3   : > { %v1006_v14 = vpop.f32.mrf.mxu1  ;;  %1970 = vmatprep.subr.bf16.mxu1 %v2140_v45  ;;  %v2150_v45 = vld [vmem:[#allocation4 + $0x48] sm:$0xff]  }
 0x2c4   : > { %v1024_v16 = vmul.f32 %v2456_v36, %v1006_v14  ;;  %v1031_v19 = vpack.c.bf16 %v1023_v13, %v1019_v17 }
 0x2c6   : > { %v1032_v18 = vpack.c.bf16 %v1024_v16, %v1020_v15  ;;  %1971 = vmatpush3.bf16.msra.mxu1 %v2141_v46  ;;  %v2151_v46 = vld [vmem:[#allocation4 + $0x8] sm:$0xff]  }
 0x2c7   : > { %1972 = vmatprep.subr.bf16.mxu1 %v2142_v47  ;;  %v2152_v47 = vld [vmem:[#allocation4 + $0x40] sm:$0xff]  }
 0x2c8   : > { %1460 = vmatprep.mubr.bf16.mxu1 %v1032_v18 }
 0x2c9   : > { %1461 = vmatmul.mubr.bf16.gmra.mxu1 %v1031_v19 }
 0x2ca   : > { %1973 = vmatpush3.bf16.msra.mxu1 %v2143_v48  ;;  %v2153_v48 = vld [vmem:[#allocation4] sm:$0xff]  }
 0x2cb   : > { %v937_v20 = vpop.f32.mrf.mxu0  ;;  %1974 = vmatprep.subr.bf16.mxu1 %v2144_v49 }
 0x2cc   : > { %v1009_v28 = vmul.f32 %v2452_v33, %v937_v20 }
 0x2cd   : > { %v939_v21 = vpop.f32.mrf.mxu0 }
 0x2ce   : > { %v1010_v25 = vmul.f32 %v2452_v33, %v939_v21  ;;  %1975 = vmatpush3.bf16.msra.mxu1 %v2145_v50 }
 0x2cf   : > { %v941_v22 = vpop.f32.mrf.mxu0  ;;  %1976 = vmatprep.subr.bf16.mxu1 %v2146_v51 }
 0x2d0   : > { %v1013_v23 = vmul.f32 %v2447_v30, %v941_v22 }
 0x2d1   : > { %v943_v24 = vpop.f32.mrf.mxu0 }
 0x2d2   : > { %v1014_v26 = vmul.f32 %v2447_v30, %v943_v24  ;;  %v1025_v34 = vpack.c.bf16 %v1013_v23, %v1009_v28  ;;  %1977 = vmatpush3.bf16.msra.mxu1 %v2147_v52 }
 0x2d3   : > { %v947_v29 = vpop.f32.mrf.mxu0  ;;  %1978 = vmatprep.subr.bf16.mxu1 %v2148_v43 }
 0x2d4   : > { %v1026_v32 = vpack.c.bf16 %v1014_v26, %v1010_v25  ;;  %v1017_v41 = vmul.f32 %v2443_v27, %v947_v29 }
 0x2d5   : > { %v949_v35 = vpop.f32.mrf.mxu0 }
 0x2d6   : > { %1397 = vmatprep.mubr.bf16.mxu0 %v1026_v32  ;;  %v1018_v3 = vmul.f32 %v2443_v27, %v949_v35  ;;  %1979 = vmatpush3.bf16.msra.mxu1 %v2149_v44 }
 0x2d7   : > { %v951_v37 = vpop.f32.mrf.mxu0  ;;  %1398 = vmatmul.mubr.bf16.vlgmr.msra.gmra.mxu0 %v1025_v34  ;;  %1980 = vmatprep.subr.bf16.mxu1 %v2150_v45 }
 0x2d8   : > { %v1021_v38 = vmul.f32 %v2456_v36, %v951_v37 }
 0x2d9   : > { %v953_v39 = vpop.f32.mrf.mxu0 }
 0x2da   : > { %v1022_v40 = vmul.f32 %v2456_v36, %v953_v39  ;;  %v1029_v31 = vpack.c.bf16 %v1021_v38, %v1017_v41  ;;  %1981 = vmatpush3.bf16.msra.mxu1 %v2151_v46 }
 0x2db   : > { %1982 = vmatprep.subr.bf16.mxu1 %v2152_v47 }
 0x2dc   : > { %v1030_v42 = vpack.c.bf16 %v1022_v40, %v1018_v3 }
 0x2de   : > { %1407 = vmatprep.mubr.bf16.mxu0 %v1030_v42  ;;  %1983 = vmatpush3.bf16.msra.mxu1 %v2153_v48 }
 0x2df   : > { %1408 = vmatmul.mubr.bf16.gmra.mxu0 %v1029_v31 }
 0x2e0   : > { %1547 = vmatprep.mubr.bf16.mxu0 %v2237_v4 }
 0x381   : > { %v1452_v53 = vpop.f32.mrf.mxu1 }
 0x383   : > { %v1454_v54 = vpop.f32.mrf.mxu1 }
 0x385   : > { %v1456_v55 = vpop.f32.mrf.mxu1 }
 0x387   : > { %v1458_v56 = vpop.f32.mrf.mxu1 }
 0x389   : > { %v1462_v59 = vpop.f32.mrf.mxu1 }
 0x38b   : > { %v1464_v63 = vpop.f32.mrf.mxu1 }
 0x38d   : > { %v1466_v12 = vpop.f32.mrf.mxu1 }
 0x38f   : > { %v1468_v23 = vpop.f32.mrf.mxu1 }
 0x397   : > { %v1399_v57 = vpop.f32.mrf.mxu0 }
 0x398   : > { %v1400_v24 = vadd.f32 %v1399_v57, %v1038_v5 }
 0x399   : > { %v1401_v58 = vpop.f32.mrf.mxu0 }
 0x39a   : > { %v1402_v15 = vadd.f32 %v1401_v58, %v1042_v2  ;;  %v1453_v35 = vadd.f32 %v1452_v53, %v1400_v24 }
 0x39b   : > { %v1403_v60 = vpop.f32.mrf.mxu0 }
 0x39c   : > { %v1404_v17 = vadd.f32 %v1403_v60, %v1038_v5  ;;  %v1455_v7 = vadd.f32 %v1454_v54, %v1402_v15  ;;  %v1471_v42 = vmax.f32 %v1453_v35, 0.0 }
 0x39d   : > { %v1405_v61 = vpop.f32.mrf.mxu0 }
 0x39e   : > { %v1406_v9 = vadd.f32 %v1405_v61, %v1042_v2  ;;  %v1457_v6 = vadd.f32 %v1456_v55, %v1404_v17  ;;  %v1472_v38 = vmax.f32 %v1455_v7, 0.0 }
 0x39f   : > { %v1409_v1 = vpop.f32.mrf.mxu0 }
 0x3a0   : > { %v1410_v13 = vadd.f32 %v1409_v1, %v1038_v5  ;;  %v1459_v19 = vadd.f32 %v1458_v56, %v1406_v9  ;;  %v1473_v3 = vmax.f32 %v1457_v6, 0.0 }
 0x3a1   : > { %v1411_v8 = vpop.f32.mrf.mxu0 }
 0x3a2   : > { %v1412_v11 = vadd.f32 %v1411_v8, %v1042_v2  ;;  %v1463_v25 = vadd.f32 %v1462_v59, %v1410_v13  ;;  %v1474_v29 = vmax.f32 %v1459_v19, 0.0  ;;  %v1511_v31 = vpack.c.bf16 %v1473_v3, %v1471_v42 }
 0x3a3   : > { %v1413_v14 = vpop.f32.mrf.mxu0 }
 0x3a4   : > { %v1414_v16 = vadd.f32 %v1413_v14, %v1038_v5  ;;  %v1465_v20 = vadd.f32 %v1464_v63, %v1412_v11  ;;  %v1475_v37 = vmax.f32 %v1463_v25, 0.0  ;;  %v1512_v41 = vpack.c.bf16 %v1474_v29, %v1472_v38 }
 0x3a5   : > { %v1415_v18 = vpop.f32.mrf.mxu0 }
 0x3a6   : > { %v1467_v21 = vadd.f32 %v1466_v12, %v1414_v16  ;;  %v1416_v22 = vadd.f32 %v1415_v18, %v1042_v2  ;;  %v1476_v32 = vmax.f32 %v1465_v20, 0.0  ;;  %v1943_v2 = vld [vmem:[%s2537_s7] ss:$0 sm:$0xff] }
 0x3a8   : > { %v1469_v26 = vadd.f32 %v1468_v23, %v1416_v22  ;;  %v1477_v28 = vmax.f32 %v1467_v21, 0.0 }
 0x3aa   : > { %v1478_v34 = vmax.f32 %v1469_v26, 0.0  ;;  %v1513_v40 = vpack.c.bf16 %v1477_v28, %v1475_v37 }
 0x3ac   : > { %v1514_v39 = vpack.c.bf16 %v1478_v34, %v1476_v32 }
 0x3ae   : > { %1527 = vmatprep.subr.bf16.mxu0 %v1514_v39 }
 0x3af   : > { %1528 = vmatpush1.bf16.msra.mxu0 %v1513_v40 }
 0x3b0   : > { %1529 = vmatprep.subr.bf16.mxu0 %v1512_v41 }
 0x3b3   : > { %1530 = vmatpush1.bf16.msra.mxu0 %v1511_v31 }
 0x3b6   : > { %1941 = vmatmul.mubr.msk.bf16.vlgmr.msra.gmra.mxu0 %vm471_vm7, %v2426_v0 }
 0x3b7   : > { %1557 = vmatprep.mubr.bf16.mxu0 %v2237_v4 }
 0x3be   : > { %1942 = vmatmul.mubr.msk.bf16.gmra.mxu0 %vm471_vm7, %v2432_v10 }
 0x476   : > { %v1549_v49 = vpop.f32.mrf.mxu0 }
 0x477   : > { %v1568_v53 = vmul.f32 %v2452_v33, %v1549_v49 }
 0x478   : > { %v1551_v50 = vpop.f32.mrf.mxu0 }
 0x479   : > { %v1569_v10 = vmul.f32 %v2452_v33, %v1551_v50 }
 0x47a   : > { %v1553_v0 = vpop.f32.mrf.mxu0 }
 0x47b   : > { %v1570_v4 = vmul.f32 %v2447_v30, %v1553_v0 }
 0x47c   : > { %v1555_v51 = vpop.f32.mrf.mxu0 }
 0x47d   : > { %v1571_v52 = vmul.f32 %v2447_v30, %v1555_v51  ;;  %v1576_v56 = vpack.c.bf16 %v1570_v4, %v1568_v53 }
 0x47e   : > { %v1559_v54 = vpop.f32.mrf.mxu0 }
 0x47f   : > { %v1577_v55 = vpack.c.bf16 %v1571_v52, %v1569_v10  ;;  %v1572_v63 = vmul.f32 %v2443_v27, %v1559_v54 }
 0x480   : > { %v1561_v57 = vpop.f32.mrf.mxu0 }
 0x481   : > { %1715 = vmatprep.mubr.bf16.mxu1 %v1577_v55  ;;  %v1573_v61 = vmul.f32 %v2443_v27, %v1561_v57 }
 0x482   : > { %v1563_v58 = vpop.f32.mrf.mxu0  ;;  %1716 = vmatmul.mubr.bf16.vlgmr.msra.gmra.mxu1 %v1576_v56 }
 0x483   : > { %v1574_v59 = vmul.f32 %v2456_v36, %v1563_v58 }
 0x484   : > { %v1565_v60 = vpop.f32.mrf.mxu0 }
 0x485   : > { %v1575_v62 = vmul.f32 %v2456_v36, %v1565_v60  ;;  %v1578_v1 = vpack.c.bf16 %v1574_v59, %v1572_v63 }
 0x487   : > { %v1579_v30 = vpack.c.bf16 %v1575_v62, %v1573_v61 }
 0x489   : > { %1723 = vmatprep.mubr.bf16.mxu1 %v1579_v30 }
 0x48a   : > { %1724 = vmatmul.mubr.bf16.gmra.mxu1 %v1578_v1 }
 0x542   : > { %v1984_v33 = vpop.f32.mrf.mxu1 }
 0x544   : > { %v1985_v5 = vpop.f32.mrf.mxu1 }
 0x545   : > { %v1986_v8 = vadd.f32 %v1985_v5, %v1984_v33 }
 0x546   : > { %v1987_v9 = vpop.f32.mrf.mxu1 }
 0x547   : > { %v1718_v11 = vadd.f32 %v1986_v8, %v1943_v2 }
 0x548   : > { %v1988_v36 = vpop.f32.mrf.mxu1 }
 0x549   : > { %v1732_v27 = vmax.f32 %v1718_v11, 0.0  ;;  %v1989_v12 = vadd.f32 %v1988_v36, %v1987_v9 }
 0x54a   : > { %v1990_v13 = vpop.f32.mrf.mxu1 }
 0x54b   : > { %1736 = vst [vmem:[%s352_s21] sm:$0xff] %v1732_v27  ;;  %v1721_v14 = vadd.f32 %v1989_v12, %v1943_v2 }
 0x54c   : > { %v1991_v15 = vpop.f32.mrf.mxu1 }
 0x54d   : > { %v1733_v16 = vmax.f32 %v1721_v14, 0.0  ;;  %v1992_v17 = vadd.f32 %v1991_v15, %v1990_v13 }
 0x54e   : > { %v1993_v18 = vpop.f32.mrf.mxu1 }
 0x54f   : > { %1737 = vst [vmem:[%s352_s21 + $0x8] sm:$0xff] %v1733_v16  ;;  %v1726_v19 = vadd.f32 %v1992_v17, %v1943_v2 }
 0x550   : > { %v1994_v20 = vpop.f32.mrf.mxu1 }
 0x551   : > { %v1734_v21 = vmax.f32 %v1726_v19, 0.0  ;;  %v1995_v22 = vadd.f32 %v1994_v20, %v1993_v18 }
 0x553   : > { %1738 = vst [vmem:[%s352_s21 + $0x10] sm:$0xff] %v1734_v21  ;;  %v1729_v23 = vadd.f32 %v1995_v22, %v1943_v2 }
 0x555   : > { %v1735_v24 = vmax.f32 %v1729_v23, 0.0 }
 0x557   : > { %1739 = vst [vmem:[%s352_s21 + $0x18] sm:$0xff] %v1735_v24 }
 0x558 PF: > { %s20_s27 = sadd.s32 1, %s2228_s27  }
 0x559   : > { %p17_p2 = scmp.ge.s32.totalorder %s20_s27, 4  }
 0x55b   :  { %19 = sbr.rel (!%p17_p2) target bundleno = 2 (0x2), region = 94 }
 0x560   :  { %1761 = vsyncpa [#allocation3], 1 }
 0x561   :  { %1763 = vsyncpa [#allocation3 + $0x1], 1 }
 0x562   :  { %1764 = vsyncpa [#allocation5], 1 }

</bundles_post_ra>
